<compile_context>
chip_gen: v5e
topology: v5e:2x2
jax: 0.10.0
libtpu: 0.0.40
codegen_flags: <defaults>
</compile_context>

<pallas_src>
import math

import jax
import jax.numpy as jnp
from jax.experimental import pallas as pl
from jax.experimental.pallas import tpu as pltpu


# Row-tile alignment that satisfies TPU sublane packing for both f32 (8 rows)
# and bf16 (16 rows) blocks used by this kernel.
_ROW_ALIGN = 16


def _round_up(n, m):
    return ((n + m - 1) // m) * m


def hd_forward_kernel(x_ref, wp_ref, wc_ref, logits_ref, enc_ref):
    # Random projection (MXU): (TB, IN) @ (IN, D) -> (TB, D), f32 accumulate.
    proj = jnp.dot(x_ref[...], wp_ref[...], preferred_element_type=jnp.float32)

    # torchhd hard_quantize: x > 0 -> +1.0 else -1.0.  Computed in f32, stored
    # in enc_ref.dtype (+/-1 is exact in bf16, so narrowing the enc HBM stream
    # is value-exact and halves the dominant output traffic).
    enc = jnp.where(proj > 0.0, 1.0, -1.0)
    enc_ref[...] = enc.astype(enc_ref.dtype)

    # F.normalize(enc, dim=1) == enc / sqrt(hd_dim) exactly (every lane +/-1);
    # the 1/sqrt(hd_dim) factor is pre-folded into wc_ref by
    # prepare_hd_weights, so classify is a single clean f32 MXU pass.
    logits_ref[...] = jnp.dot(enc, wc_ref[...], preferred_element_type=jnp.float32)


def prepare_hd_weights(w_proj, w_cls, *, compute_dtype=jnp.bfloat16):
    """One-time weight prep (hoisted off the per-batch forward path).

    w_proj: (HD_DIM, INPUT_DIM) torchhd Projection weight.
    w_cls : (NUM_CLASSES, HD_DIM) classify Linear weight (bias=False).
    Returns (wp_t, wc_t, num_classes):
      wp_t : (INPUT_DIM, HD_DIM) in compute_dtype (projection operand).
      wc_t : (HD_DIM, NC_PAD)    f32, class axis padded to a 128-lane multiple,
             with the exact F.normalize factor 1/sqrt(HD_DIM) folded in.
    """
    hd_dim, _ = w_proj.shape
    num_classes = w_cls.shape[0]

    wp_t = w_proj.T.astype(compute_dtype)

    nc_pad = _round_up(max(num_classes, 128), 128)
    scale = 1.0 / math.sqrt(float(hd_dim))
    wc_t = jnp.zeros((hd_dim, nc_pad), dtype=jnp.float32)
    wc_t = wc_t.at[:, :num_classes].set(w_cls.T.astype(jnp.float32) * scale)
    return wp_t, wc_t, num_classes


def hd_model_forward(x, wp_t, wc_t, num_classes, *, tb=4096,
                     enc_dtype=jnp.bfloat16):
    """x: (B, C, H, W) or (B, INPUT_DIM); wp_t/wc_t from prepare_hd_weights."""
    B = x.shape[0]
    x_flat = x.reshape(B, -1).astype(wp_t.dtype)      # torch.nn.Flatten + stream cast
    input_dim = x_flat.shape[1]
    hd_dim = wp_t.shape[1]
    nc_pad = wc_t.shape[1]

    # ---- batch tiling ----
    # TB=4096 double-buffered tiles (bf16 x, bf16 enc, f32 lane-padded logits)
    # + resident weights is ~8 MiB: fits the scoped-VMEM default on v5e (16
    # MiB), v6e (32 MiB) and v7x (32 MiB) with headroom.
    b_aligned = _round_up(max(B, _ROW_ALIGN), _ROW_ALIGN)
    tb_eff = max(_ROW_ALIGN, _round_up(min(tb, b_aligned), _ROW_ALIGN))
    # v7x megacore: guarantee >= 2 grid steps whenever the padded batch allows
    # it, so the "parallel" axis shards across both TensorCores.
    if b_aligned // tb_eff < 2 and b_aligned >= 2 * _ROW_ALIGN:
        tb_eff = _round_up(-(-b_aligned // 2), _ROW_ALIGN)
    b_pad = _round_up(b_aligned, tb_eff)
    if b_pad != B:
        x_flat = jnp.pad(x_flat, ((0, b_pad - B), (0, 0)))
    grid = (b_pad // tb_eff,)

    logits_pad, enc_pad = pl.pallas_call(
        hd_forward_kernel,
        out_shape=(
            jax.ShapeDtypeStruct((b_pad, nc_pad), jnp.float32),
            jax.ShapeDtypeStruct((b_pad, hd_dim), enc_dtype),
        ),
        grid=grid,
        in_specs=[
            pl.BlockSpec((tb_eff, input_dim), lambda i: (i, 0)),
            pl.BlockSpec((input_dim, hd_dim), lambda i: (0, 0)),   # resident
            pl.BlockSpec((hd_dim, nc_pad), lambda i: (0, 0)),      # resident
        ],
        out_specs=(
            pl.BlockSpec((tb_eff, nc_pad), lambda i: (i, 0)),      # lane-dense
            pl.BlockSpec((tb_eff, hd_dim), lambda i: (i, 0)),
        ),
        compiler_params=pltpu.CompilerParams(
            dimension_semantics=("parallel",),
        ),
    )(x_flat, wp_t, wc_t)

    # Trim back to the module's interface.  Padded rows (zero input ->
    # enc = -1) are fabricated and must not be consumed beyond [:B].
    logits = logits_pad[:B, :num_classes]
    enc = enc_pad if b_pad == B else enc_pad[:B]
    return logits, enc


def _reference_forward(x, w_proj, w_cls, *, compute_dtype=jnp.float32):
    """Pure-JAX reference mirroring the PyTorch forward.

    compute_dtype controls the projection operand dtype so the production
    bf16-stream path can be checked against a reference with identical sign
    decisions; the rest of the pipeline stays f32 like the PyTorch module.
    """
    B = x.shape[0]
    x_flat = x.reshape(B, -1)
    proj = jnp.dot(x_flat.astype(compute_dtype), w_proj.T.astype(compute_dtype),
                   preferred_element_type=jnp.float32)
    enc = jnp.where(proj > 0.0, 1.0, -1.0).astype(jnp.float32)
    nrm = jnp.maximum(jnp.linalg.norm(enc, axis=1, keepdims=True), 1e-12)
    logits = (enc / nrm) @ w_cls.astype(jnp.float32).T
    return logits, enc


if __name__ == "__main__":
    key = jax.random.PRNGKey(0)
    k_x, k_wp, k_wc = jax.random.split(key, 3)

    B, C, H, W = 2, 1, 8, 8            # mnist-like, opt.size = 8 -> input_dim = 64
    INPUT_DIM = C * H * W
    HD_DIM = 128                       # opt.dim
    NUM_CLASSES = 10                   # method='BasicHD'

    x = jax.random.normal(k_x, (B, C, H, W), dtype=jnp.float32)
    # torchhd embeddings.Projection weight ~ Normal(0, 1), shape (hd_dim, input_dim)
    w_proj = jax.random.normal(k_wp, (HD_DIM, INPUT_DIM), dtype=jnp.float32)
    w_cls_zero = jnp.zeros((NUM_CLASSES, HD_DIM), dtype=jnp.float32)   # as-initialized
    w_cls_rand = jax.random.normal(k_wc, (NUM_CLASSES, HD_DIM), dtype=jnp.float32)

    # ---- Case 1: exact-semantics path (f32 streams), zero classify weights ----
    wp0, wc0, nc0 = prepare_hd_weights(w_proj, w_cls_zero, compute_dtype=jnp.float32)
    logits0, enc0 = hd_model_forward(x, wp0, wc0, nc0, enc_dtype=jnp.float32)
    jax.block_until_ready((logits0, enc0))
    ref_logits0, ref_enc0 = _reference_forward(x, w_proj, w_cls_zero)
    assert jnp.allclose(logits0, ref_logits0, atol=1e-5), "logits mismatch (f32, zero weights)"
    assert jnp.allclose(enc0, ref_enc0, atol=1e-5), "enc mismatch (f32, zero weights)"

    # ---- Case 2: exact-semantics path (f32 streams), random classify weights ----
    wp1, wc1, nc1 = prepare_hd_weights(w_proj, w_cls_rand, compute_dtype=jnp.float32)
    logits1, enc1 = hd_model_forward(x, wp1, wc1, nc1, enc_dtype=jnp.float32)
    jax.block_until_ready((logits1, enc1))
    ref_logits1, ref_enc1 = _reference_forward(x, w_proj, w_cls_rand)
    assert jnp.allclose(logits1, ref_logits1, atol=1e-5), "logits mismatch (f32, random weights)"
    assert jnp.allclose(enc1, ref_enc1, atol=1e-5), "enc mismatch (f32, random weights)"

    # ---- Case 3: production path (bf16 x/W_proj streams, bf16 enc output) ----
    wp2, wc2, nc2 = prepare_hd_weights(w_proj, w_cls_rand)            # bf16 default
    logits2, enc2 = hd_model_forward(x, wp2, wc2, nc2)                # bf16 enc default
    jax.block_until_ready((logits2, enc2))
    ref_logits2, ref_enc2 = _reference_forward(x, w_proj, w_cls_rand,
                                               compute_dtype=jnp.bfloat16)
    assert jnp.allclose(logits2, ref_logits2, atol=1e-4), "logits mismatch (bf16 path)"
    assert jnp.allclose(enc2.astype(jnp.float32), ref_enc2, atol=1e-5), "enc mismatch (bf16 path)"

    print("KERNEL_OK")
</pallas_src>

<mosaic_0001>
module attributes {stable_mosaic.version = 11 : i64} {
  func.func @hd_forward_kernel(%arg0: i32, %arg1: memref<16x64xf32, #tpu.memory_space<vmem>>, %arg2: memref<64x128xf32, #tpu.memory_space<vmem>>, %arg3: memref<128x128xf32, #tpu.memory_space<vmem>>, %arg4: memref<16x128xf32, #tpu.memory_space<vmem>>, %arg5: memref<16x128xf32, #tpu.memory_space<vmem>>) attributes {dimension_semantics = [#tpu.dimension_semantics<parallel>], iteration_bounds = array<i64: 1>, scalar_prefetch = 0 : i64, scratch_operands = 0 : i64, tpu.core_type = #tpu.core_type<tc>, window_params = [{transform_indices = @transform_0, window_bounds = array<i64: 16, 64>}, {pipeline_mode = #tpu.pipeline_mode<synchronous>, transform_indices = @transform_1, window_bounds = array<i64: 64, 128>}, {pipeline_mode = #tpu.pipeline_mode<synchronous>, transform_indices = @transform_2, window_bounds = array<i64: 128, 128>}, {transform_indices = @transform_3, window_bounds = array<i64: 16, 128>}, {transform_indices = @transform_4, window_bounds = array<i64: 16, 128>}]} {
    %c0 = arith.constant 0 : index
    %c0_0 = arith.constant 0 : index
    %0 = vector.load %arg1[%c0, %c0_0] : memref<16x64xf32, #tpu.memory_space<vmem>>, vector<16x64xf32>
    %c0_1 = arith.constant 0 : index
    %c0_2 = arith.constant 0 : index
    %1 = vector.load %arg2[%c0_1, %c0_2] : memref<64x128xf32, #tpu.memory_space<vmem>>, vector<64x128xf32>
    %cst = arith.constant dense<0.000000e+00> : vector<16x128xf32>
    %2 = tpu.matmul %0, %1, %cst {dimension_numbers = #tpu.dot_dimension_numbers<[1], [0], [0], [1], [0, 0, 1, 1], [], []>} : vector<16x64xf32>, vector<64x128xf32>, vector<16x128xf32> -> vector<16x128xf32>
    %cst_3 = arith.constant 0.000000e+00 : f32
    %3 = vector.broadcast %cst_3 : f32 to vector<16x128xf32>
    %4 = arith.cmpf ogt, %2, %3 : vector<16x128xf32>
    %cst_4 = arith.constant 1.000000e+00 : f32
    %cst_5 = arith.constant -1.000000e+00 : f32
    %5 = vector.broadcast %cst_4 : f32 to vector<16x128xf32>
    %6 = vector.broadcast %cst_5 : f32 to vector<16x128xf32>
    %7 = arith.select %4, %5, %6 : vector<16x128xi1>, vector<16x128xf32>
    %c0_6 = arith.constant 0 : index
    %c0_7 = arith.constant 0 : index
    %8 = vector.load %arg5[%c0_6, %c0_7] : memref<16x128xf32, #tpu.memory_space<vmem>>, vector<16x128xf32>
    tpu.vector_store %arg5[%c0_6, %c0_7], %7 {strides = array<i32>} : memref<16x128xf32, #tpu.memory_space<vmem>>, vector<16x128xf32>,
    %c0_8 = arith.constant 0 : index
    %c0_9 = arith.constant 0 : index
    %9 = vector.load %arg3[%c0_8, %c0_9] : memref<128x128xf32, #tpu.memory_space<vmem>>, vector<128x128xf32>
    %cst_10 = arith.constant dense<0.000000e+00> : vector<16x128xf32>
    %10 = tpu.matmul %7, %9, %cst_10 {dimension_numbers = #tpu.dot_dimension_numbers<[1], [0], [0], [1], [0, 0, 1, 1], [], []>} : vector<16x128xf32>, vector<128x128xf32>, vector<16x128xf32> -> vector<16x128xf32>
    %c0_11 = arith.constant 0 : index
    %c0_12 = arith.constant 0 : index
    %11 = vector.load %arg4[%c0_11, %c0_12] : memref<16x128xf32, #tpu.memory_space<vmem>>, vector<16x128xf32>
    tpu.vector_store %arg4[%c0_11, %c0_12], %10 {strides = array<i32>} : memref<16x128xf32, #tpu.memory_space<vmem>>, vector<16x128xf32>,
    return
  }
  func.func @transform_0(%arg0: i32) -> (i32, i32) {
    %c0_i32 = arith.constant 0 : i32
    %c0_i32_0 = arith.constant 0 : i32
    return %arg0, %c0_i32 : i32, i32
  }
  func.func @transform_1(%arg0: i32) -> (i32, i32) {
    %c0_i32 = arith.constant 0 : i32
    %c0_i32_0 = arith.constant 0 : i32
    %c0_i32_1 = arith.constant 0 : i32
    return %c0_i32, %c0_i32_0 : i32, i32
  }
  func.func @transform_2(%arg0: i32) -> (i32, i32) {
    %c0_i32 = arith.constant 0 : i32
    %c0_i32_0 = arith.constant 0 : i32
    %c0_i32_1 = arith.constant 0 : i32
    return %c0_i32, %c0_i32_0 : i32, i32
  }
  func.func @transform_3(%arg0: i32) -> (i32, i32) {
    %c0_i32 = arith.constant 0 : i32
    %c0_i32_0 = arith.constant 0 : i32
    return %arg0, %c0_i32 : i32, i32
  }
  func.func @transform_4(%arg0: i32) -> (i32, i32) {
    %c0_i32 = arith.constant 0 : i32
    %c0_i32_0 = arith.constant 0 : i32
    return %arg0, %c0_i32 : i32, i32
  }
}

</mosaic_0001>

<bundles_post_ra>
// kernel: tpu_custom_call.1
= control target key start
LH: loop header
LB: loop body
LE: loop exit
PB: predicated region body
PF: predicated region fallthrough
CT: control target
= control target key end

     0   :  { %10 = vsyncpa [#allocation3], 0  ;;  %s409_s0 = inlined_call_operand.hbm [shape: f32[16,64], index: 0, kind: input, shape index: {}]   ;;  %s410_s1 = inlined_call_operand.hbm [shape: f32[64,128], index: 1, kind: input, shape index: {}]   ;;  %s411_s2 = inlined_call_operand.hbm [shape: f32[128,128], index: 2, kind: input, shape index: {}]   ;;  %s412_s3 = inlined_call_operand.hbm [shape: f32[16,128], index: 3, kind: output, shape index: {0}]   ;;  %s413_s4 = inlined_call_operand.hbm [shape: f32[16,128], index: 4, kind: output, shape index: {1}]  }
   0x1   :  { %11 = vsyncpa [#allocation6], 0 }
   0x2   :  { %12 = vsyncpa [#allocation4], 0 }
   0x3   :  { %13 = vsyncpa [#allocation10], 0  ;;  %s31_s17 = sshll.u32 %s410_s1, 4  ;;  %s344_s18 = smov [#allocation5]   ;;  %s32_s17 = int_to_ptr.hbm [resolvable:$true] %s31_s17 }
   0x4   :  { %s33_s19 = sshll.u32 %s344_s18, 4  ;;  %s18_s22 = sshll.u32 %s409_s0, 4  ;;  %s34_s19 = int_to_ptr.vmem [resolvable:$true] %s33_s19  ;;  %s19_s22 = int_to_ptr.hbm [resolvable:$true] %s18_s22 }
   0x5   :  { %s345_s23 = smov 128   ;;  %s346_s24 = smov 8  }
   0x6   :  { %39 = dma.hbm_to_vmem [thread:$0]  %s32_s17, 1024, %s34_s19, [#allocation6], %s345_s23, %s345_s23, %s346_s24  }
   0x7   :  { %s347_s25 = smov [#allocation2]   ;;  %s44_s1 = sshll.u32 %s411_s2, 4  ;;  %s45_s1 = int_to_ptr.hbm [resolvable:$true] %s44_s1 }
   0x8   :  { %s20_s26 = sshll.u32 %s347_s25, 4  ;;  %s348_s0 = smov [#allocation7]   ;;  %s21_s26 = int_to_ptr.vmem [resolvable:$true] %s20_s26 }
   0x9   :  { %26 = dma.hbm_to_vmem [thread:$0]  %s19_s22, 256, %s21_s26, [#allocation3], %s345_s23, %s345_s23, %s346_s24  }
   0xa   :  { %s46_s29 = sshll.u32 %s348_s0, 4  ;;  %s47_s29 = int_to_ptr.vmem [resolvable:$true] %s46_s29 }
   0xb   :  { %52 = dma.hbm_to_vmem [thread:$0]  %s45_s1, 2048, %s47_s29, [#allocation6], %s345_s23, %s345_s23, %s346_s24  }
   0xc   :  { %336 = dma.done.wait [#allocation3], 256  }
   0xd   :  { %337 = vsyncadd [#allocation3], 4294967040 }
   0xe   :  { %338 = dma.done.wait [#allocation6], 3072  }
   0xf   :  { %339 = vsyncadd [#allocation6], 4294964224  ;;  %v74_v0 = vld [vmem:[#allocation5 + $0x38] sm:$0xff]  ;;  %v73_v1 = vld [vmem:[#allocation5 + $0x30] sm:$0xff]  ;;  %vm75_vm0 = vcmask 523264   ;;  %v349_v27 = vmov -1.0  }
  0x10   :  { %90 = vmatpush.msra.mxu0 %v74_v0  ;;  %v72_v2 = vld [vmem:[#allocation5 + $0x28] sm:$0xff]  ;;  %v126_v3 = vld [vmem:[#allocation7 + $0x78] sm:$0xff]  ;;  %v125_v4 = vld [vmem:[#allocation7 + $0x70] sm:$0xff]  ;;  %s350_s2 = smov [#allocation9]   ;;  %s171_s7 = sshll.u32 %s413_s4, 4  ;;  %s172_s7 = int_to_ptr.hbm [resolvable:$true] %s171_s7 }
  0x11   :  { %v71_v5 = vld [vmem:[#allocation5 + $0x20] sm:$0xff]  ;;  %127 = vmatpush.msra.mxu1 %v126_v3  ;;  %192 = vmatpush.msra.mxu2 %v126_v3  ;;  %v124_v6 = vld [vmem:[#allocation7 + $0x68] sm:$0xff]  ;;  %v70_v7 = vld [vmem:[#allocation5 + $0x18] sm:$0xff]  ;;  %s169_s30 = sshll.u32 %s350_s2, 4  ;;  %s351_s8 = smov [#allocation8]   ;;  %s170_s30 = int_to_ptr.vmem [resolvable:$true] %s169_s30 }
  0x12   :  { %91 = vmatpush.msra.mxu0 %v73_v1  ;;  %v123_v8 = vld [vmem:[#allocation7 + $0x60] sm:$0xff]  ;;  %v69_v9 = vld [vmem:[#allocation5 + $0x10] sm:$0xff]  ;;  %v122_v10 = vld [vmem:[#allocation7 + $0x58] sm:$0xff]  ;;  %s156_s9 = sshll.u32 %s351_s8, 4  ;;  %s158_s12 = sshll.u32 %s412_s3, 4  ;;  %s157_s9 = int_to_ptr.vmem [resolvable:$true] %s156_s9  ;;  %s159_s12 = int_to_ptr.hbm [resolvable:$true] %s158_s12 }
  0x13   :  { %128 = vmatpush.msra.mxu1 %v125_v4  ;;  %193 = vmatpush.msra.mxu2 %v125_v4  ;;  %v68_v11 = vld [vmem:[#allocation5 + $0x8] sm:$0xff]  ;;  %v121_v12 = vld [vmem:[#allocation7 + $0x50] sm:$0xff]  ;;  %v67_v13 = vld [vmem:[#allocation5] sm:$0xff] }
  0x14   :  { %92 = vmatpush.msra.mxu0 %v72_v2  ;;  %v65_v14 = vld [vmem:[#allocation2] sm:$0xff]  ;;  %v120_v15 = vld [vmem:[#allocation7 + $0x48] sm:$0xff]  ;;  %v119_v16 = vld [vmem:[#allocation7 + $0x40] sm:$0xff] }
  0x15   :  { %129 = vmatpush.msra.mxu1 %v124_v6  ;;  %194 = vmatpush.msra.mxu2 %v124_v6  ;;  %v118_v17 = vld [vmem:[#allocation7 + $0x38] sm:$0xff]  ;;  %v117_v18 = vld [vmem:[#allocation7 + $0x30] sm:$0xff]  ;;  %v116_v20 = vld [vmem:[#allocation7 + $0x28] sm:$0xff] }
  0x16   :  { %93 = vmatpush.msra.mxu0 %v71_v5  ;;  %v66_v19 = vld [vmem:[#allocation2 + $0x8] sm:$0xff]  ;;  %v115_v21 = vld [vmem:[#allocation7 + $0x20] sm:$0xff]  ;;  %v113_v23 = vld [vmem:[#allocation7 + $0x10] sm:$0xff] }
  0x17   :  { %130 = vmatpush.msra.mxu1 %v123_v8  ;;  %195 = vmatpush.msra.mxu2 %v123_v8  ;;  %v114_v22 = vld [vmem:[#allocation7 + $0x18] sm:$0xff]  ;;  %v112_v24 = vld [vmem:[#allocation7 + $0x8] sm:$0xff]  ;;  %v111_v25 = vld [vmem:[#allocation7] sm:$0xff] }
  0x18   :  { %94 = vmatpush.msra.mxu0 %v70_v7 }
  0x19   :  { %131 = vmatpush.msra.mxu1 %v122_v10  ;;  %196 = vmatpush.msra.mxu2 %v122_v10 }
  0x1a   :  { %95 = vmatpush.msra.mxu0 %v69_v9 }
  0x1b   :  { %132 = vmatpush.msra.mxu1 %v121_v12  ;;  %197 = vmatpush.msra.mxu2 %v121_v12 }
  0x1c   :  { %96 = vmatpush.msra.mxu0 %v68_v11 }
  0x1d   :  { %133 = vmatpush.msra.mxu1 %v120_v15  ;;  %198 = vmatpush.msra.mxu2 %v120_v15 }
  0x1e   :  { %97 = vmatpush.msra.mxu0 %v67_v13 }
  0x1f   :  { %190 = vmatmul.msk.f32.vlgmr.msra.gmra.mxu0 %vm75_vm0, %v65_v14  ;;  %134 = vmatpush.msra.mxu1 %v119_v16 }
  0x20   :  { %199 = vmatpush.msra.mxu2 %v119_v16 }
  0x21   :  { %135 = vmatpush.msra.mxu1 %v118_v17 }
  0x22   :  { %200 = vmatpush.msra.mxu2 %v118_v17 }
  0x23   :  { %136 = vmatpush.msra.mxu1 %v117_v18 }
  0x24   :  { %201 = vmatpush.msra.mxu2 %v117_v18 }
  0x25   :  { %137 = vmatpush.msra.mxu1 %v116_v20 }
  0x26   :  { %202 = vmatpush.msra.mxu2 %v116_v20 }
  0x27   :  { %191 = vmatmul.msk.f32.gmra.mxu0 %vm75_vm0, %v66_v19  ;;  %138 = vmatpush.msra.mxu1 %v115_v21 }
  0x28   :  { %203 = vmatpush.msra.mxu2 %v115_v21 }
  0x29   :  { %139 = vmatpush.msra.mxu1 %v114_v22 }
  0x2a   :  { %204 = vmatpush.msra.mxu2 %v114_v22 }
  0x2b   :  { %140 = vmatpush.msra.mxu1 %v113_v23 }
  0x2c   :  { %205 = vmatpush.msra.mxu2 %v113_v23 }
  0x2d   :  { %141 = vmatpush.msra.mxu1 %v112_v24 }
  0x2e   :  { %206 = vmatpush.msra.mxu2 %v112_v24 }
  0x2f   :  { %142 = vmatpush.msra.mxu1 %v111_v25 }
  0x30   :  { %207 = vmatpush.msra.mxu2 %v111_v25 }
  0x9c   :  { %v99_v26 = vpop.f32.mrf.mxu0 }
  0x9d   :  { %vm105_vm1 = vcmp.gt.f32.partialorder %v99_v26, 0.0 }
  0x9e   :  { %v107_v28 = vsel %vm105_vm1, 1.0, %v349_v27 }
  0x9f   :  { %109 = vst [vmem:[#allocation9] sm:$0xff] %v107_v28  ;;  %143 = vmatmul.f32.vlgmr.msra.gmra.mxu1 %v107_v28 }
  0xa4   :  { %v102_v29 = vpop.f32.mrf.mxu0 }
  0xa5   :  { %vm106_vm2 = vcmp.gt.f32.partialorder %v102_v29, 0.0 }
  0xa6   :  { %v108_v30 = vsel %vm106_vm2, 1.0, %v349_v27 }
  0xa7   :  { %110 = vst [vmem:[#allocation9 + $0x8] sm:$0xff] %v108_v30  ;;  %146 = vmatmul.f32.vlgmr.msra.gmra.mxu2 %v108_v30 }
  0xa8   :  { %177 = dma.vmem_to_hbm [thread:$0]  %s170_s30, 256, %s172_s7, [#allocation10], %s345_s23, %s345_s23, %s346_s24  }
 0x11c   :  { %v144_v31 = vpop.f32.mrf.mxu1 }
 0x11d   :  { %150 = vst [vmem:[#allocation8] sm:$0xff] %v144_v31 }
 0x12a   :  { %v147_v32 = vpop.f32.mrf.mxu2 }
 0x12b   :  { %151 = vst [vmem:[#allocation8 + $0x8] sm:$0xff] %v147_v32 }
 0x12c   :  { %164 = dma.vmem_to_hbm [thread:$0]  %s157_s9, 256, %s159_s12, [#allocation4], %s345_s23, %s345_s23, %s346_s24  }
 0x12d   :  { %340 = dma.done.wait [#allocation4], 256  }
 0x12e   :  { %341 = vsyncadd [#allocation4], 4294967040 }
 0x12f   :  { %342 = dma.done.wait [#allocation10], 256  }
 0x130   :  { %343 = vsyncadd [#allocation10], 4294967040 }
 0x131   :  { %186 = vsyncpa [#allocation3], 1 }
 0x132   :  { %187 = vsyncpa [#allocation6], 1 }
 0x133   :  { %188 = vsyncpa [#allocation4], 1 }
 0x134   :  { %189 = vsyncpa [#allocation10], 1 }

</bundles_post_ra>
